<compile_context>
chip_gen: v7x
topology: tpu7x:2x2x1
jax: 0.10.0
libtpu: 0.0.40
codegen_flags: <defaults>
</compile_context>

<pallas_src>
import jax
import jax.numpy as jnp
from jax.experimental import pallas as pl
from jax.experimental.pallas import tpu as pltpu

NUM_JOINTS_OUT = 33   # pyranet (FastPose duc_se) emits 33 heatmap channels
NUM_JOINTS = 17       # InferenNet narrows to the first 17
HIDDEN = 32

# AlphaPose coco flipRef (1-indexed L/R joint pairs) -> 0-indexed permutation
_FLIP_REF = ((2, 3), (4, 5), (6, 7), (8, 9),
             (10, 11), (12, 13), (14, 15), (16, 17))


def _shuffle_perm(n):
    perm = list(range(n))
    for a, b in _FLIP_REF:
        perm[a - 1], perm[b - 1] = perm[b - 1], perm[a - 1]
    return jnp.array(perm, dtype=jnp.int32)


# --------------------------- Pallas kernel ----------------------------------

def _fused_head_kernel(p_ref, w1_ref, b1_ref, w2_ref, b2_ref, o_ref):
    """Fused pyranet head + folded flip-test average for one image.

    p_ref : (1, 9C, HW)             bf16  im2col patch matrix, HW on lanes
    w1_ref: (2*HIDDEN, 9C)          bf16  [normal ; dx-mirrored] 3x3 taps (transposed)
    b1_ref: (2*HIDDEN, 1)           f32
    w2_ref: (NUM_JOINTS, 2*HIDDEN)  bf16  0.5*[w2[:, :17] ; w2[:, perm]] (transposed)
    b2_ref: (NUM_JOINTS, 1)         f32   0.5*(b2[:17] + b2[perm])
    o_ref : (1, NUM_JOINTS, HW)     f32   averaged heatmaps, lane-dense store
    """
    # 3x3 conv == one MXU dot against the im2col patch matrix (K = 9*C).
    acc = jnp.dot(w1_ref[...], p_ref[0],
                  preferred_element_type=jnp.float32)          # (64, HW) f32
    # bias + ReLU on the VPU in f32, cast back to bf16 for the second MXU dot.
    h = jnp.maximum(acc + b1_ref[...], 0.0).astype(jnp.bfloat16)
    # 1x1 conv (+ folded flip average) == second MXU dot; lane-dense output.
    o_ref[0] = (jnp.dot(w2_ref[...], h, preferred_element_type=jnp.float32)
                + b2_ref[...])                                  # (17, HW) f32


# --------------------------- forward wrapper --------------------------------

def init_params(key, c_in):
    k1, k2, k3, k4 = jax.random.split(key, 4)
    return dict(
        w1=jax.random.normal(k1, (9 * c_in, HIDDEN), jnp.float32) * 0.1,
        b1=jax.random.normal(k2, (1, HIDDEN), jnp.float32) * 0.1,
        w2=jax.random.normal(k3, (HIDDEN, NUM_JOINTS_OUT), jnp.float32) * 0.1,
        b2=jax.random.normal(k4, (1, NUM_JOINTS_OUT), jnp.float32) * 0.1,
    )


def inferen_net_forward(params, x):
    """InferenNet.forward: x is NCHW float32, returns (N, 17, H, W) float32."""
    # TODO(synk): the real pyranet is FastPose_SE (SE-ResNet-50 + DUC) loaded
    # from duc_se.pth; here it is a synthetic 2-layer conv head (3x3 conv +
    # ReLU, 1x1 conv) with the same 33-channel heatmap contract.  The exact
    # flip-fold below relies on this head being a plain flip-equivariant conv
    # stack; for an arbitrary backbone one would instead batch [x, flip(x)].
    N, C, H, W = x.shape
    HW = H * W
    perm = _shuffle_perm(NUM_JOINTS)
    w1, b1, w2, b2 = params["w1"], params["b1"], params["w2"], params["b2"]

    # ---- fold the flip-test branch into the weights (exact algebra) ----
    # flip_W(pyranet(flip_W(x))) == head(x) with the 3x3 taps mirrored in dx
    # (zero 'same' padding is flip-symmetric; ReLU / 1x1 conv are pointwise).
    # narrow(1,0,17) + shuffleLR == selecting/permuting w2, b2 columns.
    # (out + flip_out)/2 == one 2nd-layer matmul with 0.5-scaled stacked w2.
    w1_flip = w1.reshape(3, 3, C, HIDDEN)[:, ::-1, :, :].reshape(9 * C, HIDDEN)
    w1_cat = jnp.concatenate([w1, w1_flip], axis=1)                 # (9C, 64)
    w2_cat = 0.5 * jnp.concatenate(
        [w2[:, :NUM_JOINTS], w2[:, perm]], axis=0)                  # (64, 17)

    w1_k = w1_cat.T.astype(jnp.bfloat16)                            # (64, 9C)
    b1_k = jnp.concatenate([b1, b1], axis=1).reshape(2 * HIDDEN, 1)  # (64, 1)
    w2_k = w2_cat.T.astype(jnp.bfloat16)                            # (17, 64)
    b2_k = (0.5 * (b2[:, :NUM_JOINTS] + b2[:, perm])
            ).reshape(NUM_JOINTS, 1)                                # (17, 1)

    # im2col in the wrapper (layout plumbing, not compute): the input is tiny,
    # the patch matrix keeps HW on the lane axis, and this removes every
    # in-kernel slice/reshape relayout plus both NCHW<->NHWC transposes.
    xp = jnp.pad(x.astype(jnp.bfloat16),
                 ((0, 0), (0, 0), (1, 1), (1, 1)))                  # (N,C,H+2,W+2)
    taps = [xp[:, :, dy:dy + H, dx:dx + W]
            for dy in range(3) for dx in range(3)]                  # 9x (N,C,H,W)
    patches = jnp.stack(taps, axis=1).reshape(N, 9 * C, HW)         # (N,9C,HW) bf16

    out = pl.pallas_call(
        _fused_head_kernel,
        out_shape=jax.ShapeDtypeStruct((N, NUM_JOINTS, HW), jnp.float32),
        grid_spec=pltpu.PrefetchScalarGridSpec(
            num_scalar_prefetch=0,
            grid=(N,),
            in_specs=[
                pl.BlockSpec((1, 9 * C, HW), lambda i: (i, 0, 0)),
                pl.BlockSpec((2 * HIDDEN, 9 * C), lambda i: (0, 0)),
                pl.BlockSpec((2 * HIDDEN, 1), lambda i: (0, 0)),
                pl.BlockSpec((NUM_JOINTS, 2 * HIDDEN), lambda i: (0, 0)),
                pl.BlockSpec((NUM_JOINTS, 1), lambda i: (0, 0)),
            ],
            out_specs=pl.BlockSpec((1, NUM_JOINTS, HW),
                                   lambda i: (i, 0, 0)),
        ),
        compiler_params=pltpu.CompilerParams(
            dimension_semantics=("parallel",)),
    )(patches, w1_k, b1_k, w2_k, b2_k)

    # (N, 17, HW) -> (N, 17, H, W): contiguous reshape, no transpose needed.
    return out.reshape(N, NUM_JOINTS, H, W)


# --------------------------- pure-JAX reference -----------------------------
# Literal f32 translation of the original InferenNet.forward, used only to
# sanity-check the fused/bf16 kernel.

def _im2col3x3(x_nhwc):
    N, H, W, C = x_nhwc.shape
    xp = jnp.pad(x_nhwc, ((0, 0), (1, 1), (1, 1), (0, 0)))
    cols = [xp[:, dy:dy + H, dx:dx + W, :]
            for dy in range(3) for dx in range(3)]
    return jnp.concatenate(cols, axis=-1)


def _pyranet_ref(params, x_nchw):
    N, C, H, W = x_nchw.shape
    xh = jnp.transpose(x_nchw, (0, 2, 3, 1))
    patches = _im2col3x3(xh).reshape(N * H * W, 9 * C)
    h = jnp.maximum(patches @ params["w1"] + params["b1"], 0.0)
    o = h @ params["w2"] + params["b2"]
    return jnp.transpose(o.reshape(N, H, W, NUM_JOINTS_OUT), (0, 3, 1, 2))


def _reference_forward(params, x):
    perm = _shuffle_perm(NUM_JOINTS)
    out = _pyranet_ref(params, x)[:, :NUM_JOINTS]
    flip_out = _pyranet_ref(params, jnp.flip(x, axis=3))[:, :NUM_JOINTS]
    flip_out = jnp.flip(flip_out[:, perm], axis=3)
    return (out + flip_out) * 0.5


if __name__ == "__main__":
    key = jax.random.PRNGKey(0)
    kx, kp = jax.random.split(key)
    N, C, H, W = 2, 4, 16, 16
    x = jax.random.normal(kx, (N, C, H, W), jnp.float32)
    params = init_params(kp, C)

    out = jax.jit(inferen_net_forward)(params, x)
    jax.block_until_ready(out)
    assert out.shape == (N, NUM_JOINTS, H, W)
    assert out.dtype == jnp.float32

    ref = jax.jit(_reference_forward)(params, x)
    jax.block_until_ready(ref)
    # bf16 MXU inputs vs f32 reference: expect ~1e-3 abs error at this scale.
    assert jnp.allclose(out, ref, atol=2e-2, rtol=2e-2), \
        float(jnp.max(jnp.abs(out - ref)))

    print("KERNEL_OK")
</pallas_src>

<mosaic_0001>
module attributes {stable_mosaic.version = 11 : i64} {
  func.func @_fused_head_kernel(%arg0: i32, %arg1: memref<1x36x256xbf16, #tpu.memory_space<vmem>>, %arg2: memref<64x36xbf16, #tpu.memory_space<vmem>>, %arg3: memref<64x1xf32, #tpu.memory_space<vmem>>, %arg4: memref<17x64xbf16, #tpu.memory_space<vmem>>, %arg5: memref<17x1xf32, #tpu.memory_space<vmem>>, %arg6: memref<1x17x256xf32, #tpu.memory_space<vmem>>) attributes {dimension_semantics = [#tpu.dimension_semantics<parallel>], iteration_bounds = array<i64: 2>, scalar_prefetch = 0 : i64, scratch_operands = 0 : i64, tpu.core_type = #tpu.core_type<tc>, window_params = [{transform_indices = @transform_0, window_bounds = array<i64: 1, 36, 256>}, {pipeline_mode = #tpu.pipeline_mode<synchronous>, transform_indices = @transform_1, window_bounds = array<i64: 64, 36>}, {pipeline_mode = #tpu.pipeline_mode<synchronous>, transform_indices = @transform_2, window_bounds = array<i64: 64, 1>}, {pipeline_mode = #tpu.pipeline_mode<synchronous>, transform_indices = @transform_3, window_bounds = array<i64: 17, 64>}, {pipeline_mode = #tpu.pipeline_mode<synchronous>, transform_indices = @transform_4, window_bounds = array<i64: 17, 1>}, {transform_indices = @transform_5, window_bounds = array<i64: 1, 17, 256>}]} {
    %c0 = arith.constant 0 : index
    %c0_0 = arith.constant 0 : index
    %0 = vector.load %arg2[%c0, %c0_0] : memref<64x36xbf16, #tpu.memory_space<vmem>>, vector<64x36xbf16>
    %c0_1 = arith.constant 0 : index
    %c0_2 = arith.constant 0 : index
    %c0_3 = arith.constant 0 : index
    %1 = vector.load %arg1[%c0_1, %c0_2, %c0_3] : memref<1x36x256xbf16, #tpu.memory_space<vmem>>, vector<1x36x256xbf16>
    %2 = vector.shape_cast %1 : vector<1x36x256xbf16> to vector<36x256xbf16>
    %cst = arith.constant dense<0.000000e+00> : vector<64x256xf32>
    %3 = tpu.matmul %0, %2, %cst {dimension_numbers = #tpu.dot_dimension_numbers<[1], [0], [0], [1], [0, 0, 1, 1], [], []>} : vector<64x36xbf16>, vector<36x256xbf16>, vector<64x256xf32> -> vector<64x256xf32>
    %c0_4 = arith.constant 0 : index
    %c0_5 = arith.constant 0 : index
    %4 = vector.load %arg3[%c0_4, %c0_5] : memref<64x1xf32, #tpu.memory_space<vmem>>, vector<64x1xf32>
    %5 = vector.broadcast %4 : vector<64x1xf32> to vector<64x256xf32>
    %6 = arith.addf %3, %5 : vector<64x256xf32>
    %cst_6 = arith.constant 0.000000e+00 : f32
    %7 = vector.broadcast %cst_6 : f32 to vector<64x256xf32>
    %8 = arith.maximumf %6, %7 : vector<64x256xf32>
    %9 = arith.truncf %8 : vector<64x256xf32> to vector<64x256xbf16>
    %c0_7 = arith.constant 0 : index
    %c0_8 = arith.constant 0 : index
    %10 = vector.load %arg4[%c0_7, %c0_8] : memref<17x64xbf16, #tpu.memory_space<vmem>>, vector<17x64xbf16>
    %cst_9 = arith.constant dense<0.000000e+00> : vector<17x256xf32>
    %11 = tpu.matmul %10, %9, %cst_9 {dimension_numbers = #tpu.dot_dimension_numbers<[1], [0], [0], [1], [0, 0, 1, 1], [], []>} : vector<17x64xbf16>, vector<64x256xbf16>, vector<17x256xf32> -> vector<17x256xf32>
    %c0_10 = arith.constant 0 : index
    %c0_11 = arith.constant 0 : index
    %12 = vector.load %arg5[%c0_10, %c0_11] : memref<17x1xf32, #tpu.memory_space<vmem>>, vector<17x1xf32>
    %13 = vector.broadcast %12 : vector<17x1xf32> to vector<17x256xf32>
    %14 = arith.addf %11, %13 : vector<17x256xf32>
    %c0_12 = arith.constant 0 : index
    %c0_13 = arith.constant 0 : index
    %c0_14 = arith.constant 0 : index
    %15 = vector.load %arg6[%c0_12, %c0_13, %c0_14] : memref<1x17x256xf32, #tpu.memory_space<vmem>>, vector<1x17x256xf32>
    %16 = vector.shape_cast %15 : vector<1x17x256xf32> to vector<17x256xf32>
    %17 = vector.shape_cast %14 : vector<17x256xf32> to vector<1x17x256xf32>
    tpu.vector_store %arg6[%c0_12, %c0_13, %c0_14], %17 {strides = array<i32>} : memref<1x17x256xf32, #tpu.memory_space<vmem>>, vector<1x17x256xf32>,
    return
  }
  func.func @transform_0(%arg0: i32) -> (i32, i32, i32) {
    %c0_i32 = arith.constant 0 : i32
    %c0_i32_0 = arith.constant 0 : i32
    %c0_i32_1 = arith.constant 0 : i32
    return %arg0, %c0_i32, %c0_i32_0 : i32, i32, i32
  }
  func.func @transform_1(%arg0: i32) -> (i32, i32) {
    %c0_i32 = arith.constant 0 : i32
    %c0_i32_0 = arith.constant 0 : i32
    %c0_i32_1 = arith.constant 0 : i32
    return %c0_i32, %c0_i32_0 : i32, i32
  }
  func.func @transform_2(%arg0: i32) -> (i32, i32) {
    %c0_i32 = arith.constant 0 : i32
    %c0_i32_0 = arith.constant 0 : i32
    %c0_i32_1 = arith.constant 0 : i32
    return %c0_i32, %c0_i32_0 : i32, i32
  }
  func.func @transform_3(%arg0: i32) -> (i32, i32) {
    %c0_i32 = arith.constant 0 : i32
    %c0_i32_0 = arith.constant 0 : i32
    %c0_i32_1 = arith.constant 0 : i32
    return %c0_i32, %c0_i32_0 : i32, i32
  }
  func.func @transform_4(%arg0: i32) -> (i32, i32) {
    %c0_i32 = arith.constant 0 : i32
    %c0_i32_0 = arith.constant 0 : i32
    %c0_i32_1 = arith.constant 0 : i32
    return %c0_i32, %c0_i32_0 : i32, i32
  }
  func.func @transform_5(%arg0: i32) -> (i32, i32, i32) {
    %c0_i32 = arith.constant 0 : i32
    %c0_i32_0 = arith.constant 0 : i32
    %c0_i32_1 = arith.constant 0 : i32
    return %arg0, %c0_i32, %c0_i32_0 : i32, i32, i32
  }
}

</mosaic_0001>

<bundles_post_ra>
// kernel: inferen_net_forward.1
= control target key start
LH: loop header
LB: loop body
LE: loop exit
PB: predicated region body
PF: predicated region fallthrough
CT: control target
= control target key end

     0   :  { %s691_s18 = smov 0   ;;  %s775_s0 = inlined_call_operand.vmem [shape: bf16[2,36,256], index: 0, kind: input, shape index: {}]   ;;  %s776_s1 = inlined_call_operand.vmem [shape: bf16[64,36], index: 1, kind: input, shape index: {}]   ;;  %s777_s2 = inlined_call_operand.vmem [shape: f32[64,1], index: 2, kind: input, shape index: {}]   ;;  %s778_s3 = inlined_call_operand.vmem [shape: bf16[17,64], index: 3, kind: input, shape index: {}]   ;;  %s779_s4 = inlined_call_operand.vmem [shape: f32[17,1], index: 4, kind: input, shape index: {}]   ;;  %s780_s5 = inlined_call_operand.vmem [shape: f32[2,17,256], index: 5, kind: output, shape index: {}]  }
   0x1 LB: > { %s597_s19 = sadd.s32 4294967295, %s658_s18   ;;  %p601_p0 = scmp.ge.s32.totalorder %s658_s18, 1  ;;  %s658_s18 = sphi %s691_s18, %s15_s18  }
   0x2   : > { %p187_p1 = scmp.lt.s32.totalorder %s658_s18, 3 }
   0x4   : > { %p188_p2 = pnand %p601_p0, %p187_p1 }
   0x5   : > { %p215_p3 = scmp.lt.s32.totalorder (!%p188_p2), %s597_s19, 1  ;;  %v660_v0 = vmov (!%p188_p2), 0   ;;  %v239_v1 = vld [vmem:[%s777_s2] sm:$0xff] (!%p188_p2)  ;;  %v241_v2 = vld [vmem:[%s777_s2 + $0x10] sm:$0xff] (!%p188_p2)  ;;  %v240_v3 = vld [vmem:[%s777_s2 + $0x8] sm:$0xff] (!%p188_p2)  ;;  %vm345_vm0 = vcmask (!%p188_p2), 1041408  }
   0x6   : > { %191 = sbr.rel (%p188_p2) target bundleno = 503 (0x1f7), region = 40  ;;  %384 = vmatprep.mubr.bf16.mxu0 (!%p188_p2), %v660_v0  ;;  %636 = vset.pattern.permute.xlu0 (!%p188_p2), %v660_v0  ;;  %v242_v4 = vld [vmem:[%s777_s2 + $0x18] sm:$0xff] (!%p188_p2)  ;;  %v243_v10 = vld [vmem:[%s777_s2 + $0x20] sm:$0xff] (!%p188_p2)  ;;  %v244_v11 = vld [vmem:[%s777_s2 + $0x28] sm:$0xff] (!%p188_p2)  ;;  %vm332_vm1 = vcmask (!%p188_p2), 293888   ;;  %vm478_vm2 = vcmask (!%p188_p2), 523264  }
   0x7   : > { %637 = vset.pattern.permute.xlu1 (!%p188_p2), %v660_v0  ;;  %517 = vmatprep.mubr.bf16.mxu1 (!%p188_p2), %v660_v0  ;;  %v245_v14 = vld [vmem:[%s777_s2 + $0x30] sm:$0xff] (!%p188_p2)  ;;  %v246_v16 = vld [vmem:[%s777_s2 + $0x38] sm:$0xff] (!%p188_p2)  ;;  %v646_v17 = vld [vmem:[%s776_s1] sm:$0xff] (!%p188_p2)  }
   0x8   : > { %249 = vperm.xlu0 (!%p188_p2), %636, %v239_v1   ;;  %259 = vperm.xlu1 (!%p188_p2), %637, %v241_v2   ;;  %v452_v18 = vld [vmem:[%s779_s4] sm:$0xff] (!%p188_p2)  ;;  %v453_v19 = vld [vmem:[%s779_s4 + $0x8] sm:$0xff] (!%p188_p2)  ;;  %v454_v20 = vld [vmem:[%s779_s4 + $0x10] sm:$0x1] (!%p188_p2) }
   0x9   : > { %v647_v21 = vld [vmem:[%s776_s1 + $0x8] sm:$0xff] (!%p188_p2)   ;;  %v648_v22 = vld [vmem:[%s776_s1 + $0x10] sm:$0xff] (!%p188_p2)   ;;  %v649_v23 = vld [vmem:[%s776_s1 + $0x18] sm:$0xff] (!%p188_p2)  }
   0xc   : > { %254 = vperm.xlu0 (!%p188_p2), %636, %v240_v3   ;;  %264 = vperm.xlu1 (!%p188_p2), %637, %v242_v4  }
   0xd   : > { %s782_s19 = smov (!%p215_p3, %s597_s19), 1 }
   0xe   : > { %s625_s20 = smul.u32 40, %s782_s19 }
   0xf   : > { %s626_s10 = smul.u32 48, %s782_s19 }
  0x10   : > { %s219_s27 = scalar_lea.vmem %s775_s0, %s625_s20  ;;  %269 = vperm.xlu0 %636, %v243_v10   ;;  %274 = vperm.xlu1 %637, %v244_v11  }
  0x11   : > { %v638_v5 = vld [vmem:[%s219_s27 + $0x4] ss:$8 sps:$4 sm:$0xff]   ;;  %v640_v6 = vld [vmem:[%s219_s27] ss:$8 sps:$4 sm:$0xff]   ;;  %v641_v7 = vld [vmem:[%s219_s27 + $0x14] ss:$8 sps:$4 sm:$0xff]   ;;  %s224_s13 = scalar_lea.vmem %s780_s5, %s626_s10 }
  0x12   : > { %352 = vmatprep.subr.bf16.mxu0 %v638_v5  ;;  %v238_v8 = vld [vmem:[%s219_s27 + $0x20] sm:$0x33]  ;;  %v643_v9 = vld [vmem:[%s219_s27 + $0x10] ss:$8 sps:$4 sm:$0xff]  }
  0x13   : > { %353 = vmatpush1.bf16.msra.mxu0 %v640_v6  ;;  %v613_v12 = vcombine.high %v238_v8, %v238_v8  ;;  %v612_v13 = vcombine.low %v238_v8, %v238_v8 }
  0x14   : > { %354 = vmatprep.subr.bf16.mxu0 %v641_v7  ;;  %279 = vperm.xlu0 %636, %v245_v14  }
  0x15   : > { %v347_v15 = vsel %vm345_vm0, %v612_v13, 0  ;;  %284 = vperm.xlu1 %637, %v246_v16  }
  0x17   : > { %355 = vmatpush1.bf16.msra.mxu0 %v643_v9 }
  0x18   : > { %614 = vmatprep.subr.msk.bf16.mxu0 %vm345_vm0, %v613_v12  ;;  %457 = vperm.xlu0 %636, %v452_v18  }
  0x19   : > { %462 = vperm.xlu1 %637, %v453_v19  }
  0x1b   : > { %357 = vmatpush1.bf16.msra.mxu0 %v347_v15 }
  0x1c   : > { %467 = vperm.xlu0 %636, %v454_v20  }
  0x1e   : > { %615 = vmatmul.mubr.msk.bf16.vlgmr.msra.gmra.mrb[0].mxu0 %vm332_vm1, %v646_v17 }
  0x1f   : > { %394 = vmatprep.mubr.bf16.mxu0 %v660_v0 }
  0x26   : > { %616 = vmatmul.mubr.msk.bf16.gmra.mrb[4].mxu0 %vm332_vm1, %v647_v21 }
  0x27   : > { %404 = vmatprep.mubr.bf16.mxu0 %v660_v0 }
  0x2e   : > { %617 = vmatmul.mubr.msk.bf16.gmra.mrb[8].mxu0 %vm332_vm1, %v648_v22 }
  0x2f   : > { %414 = vmatprep.mubr.bf16.mxu0 %v660_v0 }
  0x36   : > { %618 = vmatmul.mubr.msk.bf16.gmra.mrb[12].mxu0 %vm332_vm1, %v649_v23 }
  0x87   : > { %v250_v24 = vpop.permute.xlu0 %249  ;;  %v260_v33 = vpop.permute.xlu1 %259 }
  0x8b   : > { %v255_v28 = vpop.permute.xlu0 %254  ;;  %v265_v44 = vpop.permute.xlu1 %264 }
  0x8f   : > { %v270_v55 = vpop.permute.xlu0 %269  ;;  %v275_v60 = vpop.permute.xlu1 %274 }
  0x93   : > { %v280_v8 = vpop.permute.xlu0 %279 }
  0x94   : > { %v285_v13 = vpop.permute.xlu1 %284 }
  0xf1   : > { %v386_v25 = vpop.f32.mrb[0].mxu0 }
  0xf2   : > { %v387_v26 = vadd.f32 %v386_v25, %v250_v24  ;;  %v388_v27 = vpop.f32.mrb[1].mxu0  ;;  %v650_v25 = vld [vmem:[%s778_s3] sm:$0xff]  }
  0xf3   : > { %v389_v29 = vadd.f32 %v388_v27, %v250_v24  ;;  %v390_v30 = vpop.f32.mrb[2].mxu0  ;;  %v458_v27 = vpop.permute.xlu0 %457 }
  0xf4   : > { %v391_v31 = vadd.f32 %v390_v30, %v255_v28  ;;  %v392_v32 = vpop.f32.mrb[3].mxu0  ;;  %v425_v35 = vmax.f32 %v387_v26, 0.0  ;;  %v651_v26 = vld [vmem:[%s778_s3 + $0x8] ss:$0 sps:$4 sm:$0x11]  }
  0xf5   : > { %v393_v34 = vadd.f32 %v392_v32, %v255_v28  ;;  %v426_v37 = vmax.f32 %v389_v29, 0.0 }
  0xf6   : > { %v427_v36 = vmax.f32 %v391_v31, 0.0  ;;  %v463_v31 = vpop.permute.xlu1 %462 }
  0xf7   : > { %v428_v38 = vmax.f32 %v393_v34, 0.0 }
  0xf8   : > { %v441_v39 = vpack.c.bf16 %v427_v36, %v425_v35  ;;  %v468_v36 = vpop.permute.xlu0 %467 }
  0xf9   : > { %v396_v40 = vpop.f32.mrb[4].mxu0  ;;  %v442_v41 = vpack.c.bf16 %v428_v38, %v426_v37 }
  0xfa   : > { %v397_v42 = vadd.f32 %v396_v40, %v260_v33  ;;  %v398_v43 = vpop.f32.mrb[5].mxu0 }
  0xfb   : > { %v399_v45 = vadd.f32 %v398_v43, %v260_v33  ;;  %v400_v46 = vpop.f32.mrb[6].mxu0  ;;  %485 = vmatprep.subr.bf16.mxu1 %v442_v41 }
  0xfc   : > { %v401_v47 = vadd.f32 %v400_v46, %v265_v44  ;;  %v402_v48 = vpop.f32.mrb[7].mxu0  ;;  %486 = vmatpush1.bf16.msra.mxu1 %v441_v39  ;;  %v429_v50 = vmax.f32 %v397_v42, 0.0 }
  0xfd   : > { %v403_v49 = vadd.f32 %v402_v48, %v265_v44  ;;  %v430_v52 = vmax.f32 %v399_v45, 0.0 }
  0xfe   : > { %v431_v51 = vmax.f32 %v401_v47, 0.0 }
  0xff   : > { %v432_v53 = vmax.f32 %v403_v49, 0.0 }
 0x100   : > { %v443_v54 = vpack.c.bf16 %v431_v51, %v429_v50 }
 0x101   : > { %v444_v56 = vpack.c.bf16 %v432_v53, %v430_v52  ;;  %v406_v57 = vpop.f32.mrb[8].mxu0 }
 0x102   : > { %v407_v58 = vadd.f32 %v406_v57, %v270_v55  ;;  %v408_v59 = vpop.f32.mrb[9].mxu0 }
 0x103   : > { %v409_v61 = vadd.f32 %v408_v59, %v270_v55  ;;  %v410_v62 = vpop.f32.mrb[10].mxu0  ;;  %487 = vmatprep.subr.bf16.mxu1 %v444_v56 }
 0x104   : > { %v411_v63 = vadd.f32 %v410_v62, %v275_v60  ;;  %v412_v1 = vpop.f32.mrb[11].mxu0  ;;  %488 = vmatpush1.bf16.msra.mxu1 %v443_v54  ;;  %v433_v3 = vmax.f32 %v407_v58, 0.0 }
 0x105   : > { %v413_v2 = vadd.f32 %v412_v1, %v275_v60  ;;  %v434_v5 = vmax.f32 %v409_v61, 0.0 }
 0x106   : > { %v435_v4 = vmax.f32 %v411_v63, 0.0 }
 0x107   : > { %v436_v6 = vmax.f32 %v413_v2, 0.0 }
 0x108   : > { %v445_v7 = vpack.c.bf16 %v435_v4, %v433_v3 }
 0x109   : > { %v446_v9 = vpack.c.bf16 %v436_v6, %v434_v5  ;;  %v416_v10 = vpop.f32.mrb[12].mxu0 }
 0x10a   : > { %v417_v11 = vadd.f32 %v416_v10, %v280_v8  ;;  %v418_v12 = vpop.f32.mrb[13].mxu0 }
 0x10b   : > { %v419_v14 = vadd.f32 %v418_v12, %v280_v8  ;;  %v420_v15 = vpop.f32.mrb[14].mxu0  ;;  %489 = vmatprep.subr.bf16.mxu1 %v446_v9 }
 0x10c   : > { %v421_v16 = vadd.f32 %v420_v15, %v285_v13  ;;  %v422_v17 = vpop.f32.mrb[15].mxu0  ;;  %490 = vmatpush1.bf16.msra.mxu1 %v445_v7  ;;  %v437_v19 = vmax.f32 %v417_v11, 0.0 }
 0x10d   : > { %v423_v18 = vadd.f32 %v422_v17, %v285_v13  ;;  %v438_v21 = vmax.f32 %v419_v14, 0.0 }
 0x10e   : > { %v439_v20 = vmax.f32 %v421_v16, 0.0 }
 0x10f   : > { %v440_v22 = vmax.f32 %v423_v18, 0.0 }
 0x110   : > { %v447_v23 = vpack.c.bf16 %v439_v20, %v437_v19 }
 0x111   : > { %v448_v24 = vpack.c.bf16 %v440_v22, %v438_v21 }
 0x113   : > { %491 = vmatprep.subr.bf16.mxu1 %v448_v24 }
 0x114   : > { %492 = vmatpush1.bf16.msra.mxu1 %v447_v23 }
 0x117   : > { %621 = vmatmul.mubr.msk.bf16.vlgmr.msra.gmra.mrb[0].mxu1 %vm478_vm2, %v650_v25 }
 0x118   : > { %527 = vmatprep.mubr.bf16.mxu1 %v660_v0 }
 0x11f   : > { %622 = vmatmul.mubr.msk.bf16.gmra.mrb[4].mxu1 %vm478_vm2, %v651_v26 }
 0x1ea   : > { %v519_v28 = vpop.f32.mrb[0].mxu1 }
 0x1eb   : > { %v520_v29 = vadd.f32 %v519_v28, %v458_v27  ;;  %v521_v30 = vpop.f32.mrb[1].mxu1 }
 0x1ec   : > { %v522_v32 = vadd.f32 %v521_v30, %v458_v27  ;;  %v523_v33 = vpop.f32.mrb[2].mxu1 }
 0x1ed   : > { %536 = vst [vmem:[%s224_s13] sm:$0xff] %v520_v29  ;;  %v524_v34 = vadd.f32 %v523_v33, %v463_v31  ;;  %v525_v0 = vpop.f32.mrb[3].mxu1 }
 0x1ee   : > { %537 = vst [vmem:[%s224_s13 + $0x8] sm:$0xff] %v522_v32  ;;  %v526_v35 = vadd.f32 %v525_v0, %v463_v31 }
 0x1ef   : > { %538 = vst [vmem:[%s224_s13 + $0x10] sm:$0xff] %v524_v34 }
 0x1f0   : > { %539 = vst [vmem:[%s224_s13 + $0x18] sm:$0xff] %v526_v35 }
 0x1f2   : > { %v529_v37 = vpop.f32.mrb[4].mxu1 }
 0x1f3   : > { %v530_v38 = vadd.f32 %v529_v37, %v468_v36  ;;  %v531_v39 = vpop.f32.mrb[5].mxu1 }
 0x1f4   : > { %v532_v40 = vadd.f32 %v531_v39, %v468_v36  ;;  %v533_v41 = vpop.f32.mrb[6].mxu1 }
 0x1f5   : > { %540 = vst [vmem:[%s224_s13 + $0x20] sm:$0x1] %v530_v38  ;;  %v534_v42 = vpop.f32.mrb[7].mxu1 }
 0x1f6   : > { %541 = vst [vmem:[%s224_s13 + $0x28] sm:$0x1] %v532_v40 }
 0x1f7 PF: > { %s15_s18 = sadd.s32 1, %s658_s18  }
 0x1f8   : > { %p12_p4 = scmp.ge.s32.totalorder %s15_s18, 4  }
 0x1fa   :  { %14 = sbr.rel (!%p12_p4) target bundleno = 1 (0x1), region = 70 }

</bundles_post_ra>
